<compile_context>
chip_gen: v5e
topology: v5e:2x2
jax: 0.10.0
libtpu: 0.0.40
codegen_flags: <defaults>
</compile_context>

<pallas_src>
import jax
import jax.numpy as jnp
from jax.experimental import pallas as pl
from jax.experimental.pallas import tpu as pltpu


def _res_mlp_mixer_kernel(x_ref, wh_ref, bh_ref, wv_ref, bv_ref, o_ref):
    """One grid step processes a [tile_b, PD] slab of flattened samples.

    x_ref : [TB, PD]  VMEM   (PD = depth * dim, row-major: index p*dim + d)
    wh_ref: [PD, PD]  VMEM   (kron(I_P, Wh), Wh = Wh_pt^T  -> horizontal mix)
    bh_ref: [1, PD]   VMEM   (bh tiled depth times)
    wv_ref: [PD, PD]  VMEM   (kron(Wv_pt^T, I_D)           -> vertical mix)
    bv_ref: [1, PD]   VMEM   (bv repeated dim times)
    o_ref : [TB, PD]  VMEM
    """
    x = x_ref[...]                                                     # residual source

    # Horizontal mix: relu(x @ Wh_big + bh_big) + x   (one fused MXU dot)
    h = jnp.dot(x, wh_ref[...], preferred_element_type=jnp.float32)
    h = jnp.maximum(h + bh_ref[...], 0.0) + x

    # Vertical mix (transpose-free via kron layout): relu(h @ Wv_big + bv_big) + x
    v = jnp.dot(h, wv_ref[...], preferred_element_type=jnp.float32)
    v = jnp.maximum(v + bv_ref[...], 0.0) + x

    o_ref[...] = v.astype(o_ref.dtype)                                 # single full-tile store


def _round_up(n, m):
    return ((n + m - 1) // m) * m


def _choose_tile_b(B, PD, *, dtype_bytes=4, target_block_bytes=4 * 1024 * 1024):
    """Pick the batch-tile size (rows of the flattened [B, PD] input).

    Targets ~4 MiB per input/output block (HBM-bound op; multi-MiB tiles reach
    ~85% of HBM roofline and amortize the ~0.35 us per-grid-step overhead on all
    generations), rounded to a sublane multiple of 8.  Small B simply becomes one
    tile (padded to a multiple of 8).  If a single tile would still be >= 2 MiB,
    split it in two so v7x's two TensorCores both get a grid step.
    """
    row_bytes = max(1, PD * dtype_bytes)
    tile_b = max(8, (target_block_bytes // row_bytes) // 8 * 8)

    b_pad8 = _round_up(max(B, 1), 8)
    if b_pad8 <= tile_b:
        tile_b = b_pad8
        # Megacore (v7x): keep >= 2 grid steps when each half is still a big block.
        if tile_b * row_bytes >= 2 * (2 * 1024 * 1024):
            tile_b = _round_up(pl.cdiv(tile_b, 2), 8)
    return tile_b


def res_mlp_mixer(x, wh_pt, bh, wv_pt, bv, *, tile_b=None):
    """x: [B, depth, dim] f32.  wh_pt/bh, wv_pt/bv are PyTorch-layout Linear params:
    wh_pt: [dim, dim], bh: [dim], wv_pt: [depth, depth], bv: [depth]."""
    B, P, D = x.shape
    PD = P * D
    dtype_bytes = jnp.dtype(x.dtype).itemsize

    if tile_b is None:
        tile_b = _choose_tile_b(B, PD, dtype_bytes=dtype_bytes)

    # Pad B up to a multiple of tile_b (padded rows produce junk that is sliced off).
    B_pad = _round_up(B, tile_b)
    grid = (B_pad // tile_b,)

    # Flatten samples to lane-dense [B, PD] rows (free contiguous reshape) and pad.
    x2d = x.reshape(B, PD)
    if B_pad != B:
        x2d = jnp.pad(x2d, ((0, B_pad - B), (0, 0)))

    # Kron-expanded weights (built once, outside the kernel).
    #   Wh_big[p*D+d, p'*D+d'] = I[p,p'] * Wh[d,d'],  Wh = Wh_pt^T  (so row @ Wh_big = hori_mix)
    #   Wv_big[p'*D+d', p*D+d] = Wv_pt[p,p'] * I[d',d]              (row @ Wv_big = vert_mix)
    f32 = jnp.float32
    wh_big = jnp.kron(jnp.eye(P, dtype=f32), jnp.transpose(wh_pt).astype(f32))
    wv_big = jnp.kron(jnp.transpose(wv_pt).astype(f32), jnp.eye(D, dtype=f32))
    bh_big = jnp.tile(bh.astype(f32), P).reshape(1, PD)
    bv_big = jnp.repeat(bv.astype(f32), D).reshape(1, PD)

    # VMEM budget: double-buffered in+out blocks, kron weights, and ~3 block-sized
    # live temporaries inside the kernel (x value, h, v).  Cap at 64 MiB so the
    # request is valid on v7x (64 MiB physical per TC) and generous on v5e/v6e.
    block_bytes = tile_b * PD * dtype_bytes
    weight_bytes = 2 * (PD * PD + PD) * 4
    est = 2 * (2 * block_bytes) + 3 * block_bytes + weight_bytes
    vmem_limit = int(min(64 * 1024 * 1024, max(16 * 1024 * 1024, int(est * 1.25))))

    out2d = pl.pallas_call(
        _res_mlp_mixer_kernel,
        out_shape=jax.ShapeDtypeStruct((B_pad, PD), x.dtype),
        grid_spec=pltpu.PrefetchScalarGridSpec(
            num_scalar_prefetch=0,
            grid=grid,
            in_specs=[
                pl.BlockSpec((tile_b, PD), lambda i: (i, 0)),   # x tile (lane-dense rows)
                pl.BlockSpec((PD, PD), lambda i: (0, 0)),       # Wh_big
                pl.BlockSpec((1, PD), lambda i: (0, 0)),        # bh_big
                pl.BlockSpec((PD, PD), lambda i: (0, 0)),       # Wv_big
                pl.BlockSpec((1, PD), lambda i: (0, 0)),        # bv_big
            ],
            out_specs=pl.BlockSpec((tile_b, PD), lambda i: (i, 0)),
        ),
        compiler_params=pltpu.CompilerParams(
            dimension_semantics=("parallel",),
            vmem_limit_bytes=vmem_limit,
        ),
    )(x2d, wh_big, bh_big, wv_big, bv_big)

    return out2d[:B].reshape(B, P, D)


def _reference(x, wh_pt, bh, wv_pt, bv):
    """Pure-JAX mirror of the PyTorch forward."""
    res = x
    y = jnp.maximum(jnp.einsum("bpd,od->bpo", x, wh_pt) + bh, 0.0) + res   # hori_mix
    yt = jnp.transpose(y, (0, 2, 1))                                        # [B, dim, depth]
    z = jnp.maximum(jnp.einsum("bmk,ok->bmo", yt, wv_pt) + bv, 0.0)         # vert_mix
    z = jnp.transpose(z, (0, 2, 1))
    return z + res


if __name__ == "__main__":
    # Small shapes consistent with the module: batch=2, depth=8, dim=32.
    B, P, D = 2, 8, 32

    key = jax.random.PRNGKey(0)
    kx, kwh, kbh, kwv, kbv = jax.random.split(key, 5)

    x = jax.random.normal(kx, (B, P, D), dtype=jnp.float32)

    # Deterministic PyTorch-Linear-like uniform init.
    lim_h = 1.0 / (D ** 0.5)
    lim_v = 1.0 / (P ** 0.5)
    wh_pt = jax.random.uniform(kwh, (D, D), minval=-lim_h, maxval=lim_h, dtype=jnp.float32)
    bh = jax.random.uniform(kbh, (D,), minval=-lim_h, maxval=lim_h, dtype=jnp.float32)
    wv_pt = jax.random.uniform(kwv, (P, P), minval=-lim_v, maxval=lim_v, dtype=jnp.float32)
    bv = jax.random.uniform(kbv, (P,), minval=-lim_v, maxval=lim_v, dtype=jnp.float32)

    out = res_mlp_mixer(x, wh_pt, bh, wv_pt, bv)
    out = jax.block_until_ready(out)

    ref = _reference(x, wh_pt, bh, wv_pt, bv)
    assert out.shape == (B, P, D)
    assert jnp.allclose(out, ref, atol=1e-5, rtol=1e-5), "mismatch vs reference"

    print("KERNEL_OK")
</pallas_src>

<mosaic_0001>
module attributes {stable_mosaic.version = 11 : i64} {
  func.func @_res_mlp_mixer_kernel(%arg0: i32, %arg1: memref<8x256xf32, #tpu.memory_space<vmem>>, %arg2: memref<256x256xf32, #tpu.memory_space<vmem>>, %arg3: memref<1x256xf32, #tpu.memory_space<vmem>>, %arg4: memref<256x256xf32, #tpu.memory_space<vmem>>, %arg5: memref<1x256xf32, #tpu.memory_space<vmem>>, %arg6: memref<8x256xf32, #tpu.memory_space<vmem>>) attributes {dimension_semantics = [#tpu.dimension_semantics<parallel>], iteration_bounds = array<i64: 1>, scalar_prefetch = 0 : i64, scratch_operands = 0 : i64, tpu.core_type = #tpu.core_type<tc>, window_params = [{transform_indices = @transform_0, window_bounds = array<i64: 8, 256>}, {pipeline_mode = #tpu.pipeline_mode<synchronous>, transform_indices = @transform_1, window_bounds = array<i64: 256, 256>}, {pipeline_mode = #tpu.pipeline_mode<synchronous>, transform_indices = @transform_2, window_bounds = array<i64: 1, 256>}, {pipeline_mode = #tpu.pipeline_mode<synchronous>, transform_indices = @transform_3, window_bounds = array<i64: 256, 256>}, {pipeline_mode = #tpu.pipeline_mode<synchronous>, transform_indices = @transform_4, window_bounds = array<i64: 1, 256>}, {transform_indices = @transform_5, window_bounds = array<i64: 8, 256>}]} {
    %c0 = arith.constant 0 : index
    %c0_0 = arith.constant 0 : index
    %0 = vector.load %arg1[%c0, %c0_0] : memref<8x256xf32, #tpu.memory_space<vmem>>, vector<8x256xf32>
    %c0_1 = arith.constant 0 : index
    %c0_2 = arith.constant 0 : index
    %1 = vector.load %arg2[%c0_1, %c0_2] : memref<256x256xf32, #tpu.memory_space<vmem>>, vector<256x256xf32>
    %cst = arith.constant dense<0.000000e+00> : vector<8x256xf32>
    %2 = tpu.matmul %0, %1, %cst {dimension_numbers = #tpu.dot_dimension_numbers<[1], [0], [0], [1], [0, 0, 1, 1], [], []>} : vector<8x256xf32>, vector<256x256xf32>, vector<8x256xf32> -> vector<8x256xf32>
    %c0_3 = arith.constant 0 : index
    %c0_4 = arith.constant 0 : index
    %3 = vector.load %arg3[%c0_3, %c0_4] : memref<1x256xf32, #tpu.memory_space<vmem>>, vector<1x256xf32>
    %4 = vector.broadcast %3 : vector<1x256xf32> to vector<8x256xf32>
    %5 = arith.addf %2, %4 : vector<8x256xf32>
    %cst_5 = arith.constant 0.000000e+00 : f32
    %6 = vector.broadcast %cst_5 : f32 to vector<8x256xf32>
    %7 = arith.maximumf %5, %6 : vector<8x256xf32>
    %8 = arith.addf %7, %0 : vector<8x256xf32>
    %c0_6 = arith.constant 0 : index
    %c0_7 = arith.constant 0 : index
    %9 = vector.load %arg4[%c0_6, %c0_7] : memref<256x256xf32, #tpu.memory_space<vmem>>, vector<256x256xf32>
    %cst_8 = arith.constant dense<0.000000e+00> : vector<8x256xf32>
    %10 = tpu.matmul %8, %9, %cst_8 {dimension_numbers = #tpu.dot_dimension_numbers<[1], [0], [0], [1], [0, 0, 1, 1], [], []>} : vector<8x256xf32>, vector<256x256xf32>, vector<8x256xf32> -> vector<8x256xf32>
    %c0_9 = arith.constant 0 : index
    %c0_10 = arith.constant 0 : index
    %11 = vector.load %arg5[%c0_9, %c0_10] : memref<1x256xf32, #tpu.memory_space<vmem>>, vector<1x256xf32>
    %12 = vector.broadcast %11 : vector<1x256xf32> to vector<8x256xf32>
    %13 = arith.addf %10, %12 : vector<8x256xf32>
    %cst_11 = arith.constant 0.000000e+00 : f32
    %14 = vector.broadcast %cst_11 : f32 to vector<8x256xf32>
    %15 = arith.maximumf %13, %14 : vector<8x256xf32>
    %16 = arith.addf %15, %0 : vector<8x256xf32>
    %c0_12 = arith.constant 0 : index
    %c0_13 = arith.constant 0 : index
    %17 = vector.load %arg6[%c0_12, %c0_13] : memref<8x256xf32, #tpu.memory_space<vmem>>, vector<8x256xf32>
    tpu.vector_store %arg6[%c0_12, %c0_13], %16 {strides = array<i32>} : memref<8x256xf32, #tpu.memory_space<vmem>>, vector<8x256xf32>,
    return
  }
  func.func @transform_0(%arg0: i32) -> (i32, i32) {
    %c0_i32 = arith.constant 0 : i32
    %c0_i32_0 = arith.constant 0 : i32
    return %arg0, %c0_i32 : i32, i32
  }
  func.func @transform_1(%arg0: i32) -> (i32, i32) {
    %c0_i32 = arith.constant 0 : i32
    %c0_i32_0 = arith.constant 0 : i32
    %c0_i32_1 = arith.constant 0 : i32
    return %c0_i32, %c0_i32_0 : i32, i32
  }
  func.func @transform_2(%arg0: i32) -> (i32, i32) {
    %c0_i32 = arith.constant 0 : i32
    %c0_i32_0 = arith.constant 0 : i32
    %c0_i32_1 = arith.constant 0 : i32
    return %c0_i32, %c0_i32_0 : i32, i32
  }
  func.func @transform_3(%arg0: i32) -> (i32, i32) {
    %c0_i32 = arith.constant 0 : i32
    %c0_i32_0 = arith.constant 0 : i32
    %c0_i32_1 = arith.constant 0 : i32
    return %c0_i32, %c0_i32_0 : i32, i32
  }
  func.func @transform_4(%arg0: i32) -> (i32, i32) {
    %c0_i32 = arith.constant 0 : i32
    %c0_i32_0 = arith.constant 0 : i32
    %c0_i32_1 = arith.constant 0 : i32
    return %c0_i32, %c0_i32_0 : i32, i32
  }
  func.func @transform_5(%arg0: i32) -> (i32, i32) {
    %c0_i32 = arith.constant 0 : i32
    %c0_i32_0 = arith.constant 0 : i32
    return %arg0, %c0_i32 : i32, i32
  }
}

</mosaic_0001>

<bundles_post_ra>
// kernel: tpu_custom_call.1
= control target key start
LH: loop header
LB: loop body
LE: loop exit
PB: predicated region body
PF: predicated region fallthrough
CT: control target
= control target key end

     0   :  { %10 = vsyncpa [#allocation3], 0  ;;  %s613_s0 = inlined_call_operand.hbm [shape: f32[8,256], index: 0, kind: input, shape index: {}]   ;;  %s614_s1 = inlined_call_operand.hbm [shape: f32[256,256], index: 1, kind: input, shape index: {}]   ;;  %s615_s2 = inlined_call_operand.hbm [shape: f32[1,256], index: 2, kind: input, shape index: {}]   ;;  %s616_s3 = inlined_call_operand.hbm [shape: f32[256,256], index: 3, kind: input, shape index: {}]   ;;  %s617_s4 = inlined_call_operand.vmem [shape: f32[1,256], index: 4, kind: input, shape index: {}]   ;;  %s618_s5 = inlined_call_operand.hbm [shape: f32[8,256], index: 5, kind: output, shape index: {}]  }
   0x1   :  { %11 = vsyncpa [#allocation6], 0 }
   0x2   :  { %12 = vsyncpa [#allocation9], 0  ;;  %s29_s20 = sshll.u32 %s614_s1, 4  ;;  %s30_s20 = int_to_ptr.hbm [resolvable:$true] %s29_s20 }
   0x3   :  { %13 = vsyncpa [#allocation4], 0  ;;  %s546_s21 = smov [#allocation5]   ;;  %s19_s25 = sshll.u32 %s613_s0, 4  ;;  %s20_s25 = int_to_ptr.hbm [resolvable:$true] %s19_s25 }
   0x4   :  { %s31_s22 = sshll.u32 %s546_s21, 4  ;;  %s547_s26 = smov 256   ;;  %s32_s22 = int_to_ptr.vmem [resolvable:$true] %s31_s22 }
   0x5   :  { %s548_s27 = smov 16   ;;  %s549_s28 = smov [#allocation2]  }
   0x6   :  { %37 = dma.hbm_to_vmem [thread:$0]  %s30_s20, 8192, %s32_s22, [#allocation6], %s547_s26, %s547_s26, %s548_s27  }
   0x7   :  { %s21_s29 = sshll.u32 %s549_s28, 4  ;;  %s43_s7 = sshll.u32 %s615_s2, 4  ;;  %s22_s29 = int_to_ptr.vmem [resolvable:$true] %s21_s29  ;;  %s44_s7 = int_to_ptr.hbm [resolvable:$true] %s43_s7 }
   0x8   :  { %24 = dma.hbm_to_vmem [thread:$0]  %s20_s25, 256, %s22_s29, [#allocation3]  }
   0x9   :  { %s53_s9 = sshll.u32 %s616_s3, 4  ;;  %s550_s10 = smov [#allocation7]   ;;  %s54_s9 = int_to_ptr.hbm [resolvable:$true] %s53_s9 }
   0xa   :  { %s45_s11 = sshll.u32 %s550_s10, 4  ;;  %s551_s0 = smov [#allocation8]   ;;  %s46_s11 = int_to_ptr.vmem [resolvable:$true] %s45_s11 }
   0xb   :  { %48 = dma.hbm_to_vmem [thread:$0]  %s44_s7, 32, %s46_s11, [#allocation6]  }
   0xc   :  { %s55_s12 = sshll.u32 %s551_s0, 4  ;;  %s56_s12 = int_to_ptr.vmem [resolvable:$true] %s55_s12 }
   0xd   :  { %61 = dma.hbm_to_vmem [thread:$0]  %s54_s9, 8192, %s56_s12, [#allocation9], %s547_s26, %s547_s26, %s548_s27  }
   0xe   :  { %538 = dma.done.wait [#allocation3], 256  }
   0xf   :  { %539 = vsyncadd [#allocation3], 4294967040 }
  0x10   :  { %540 = dma.done.wait [#allocation6], 8224  }
  0x11   :  { %541 = vsyncadd [#allocation6], 4294959072 }
  0x12   :  { %542 = dma.done.wait [#allocation9], 8192  }
  0x13   :  { %543 = vsyncadd [#allocation9], 4294959104  ;;  %v113_v0 = vld [vmem:[#allocation5 + $0xf8] sm:$0xff]  ;;  %v111_v1 = vld [vmem:[#allocation5 + $0xe8] sm:$0xff]  ;;  %s552_s13 = smov [#allocation10]  }
  0x14   :  { %v145_v2 = vld [vmem:[#allocation5 + $0x1f8] sm:$0xff]  ;;  %192 = vmatpush.msra.mxu2 %v113_v0  ;;  %v112_v3 = vld [vmem:[#allocation5 + $0xf0] sm:$0xff]  ;;  %v143_v4 = vld [vmem:[#allocation5 + $0x1e8] sm:$0xff]  ;;  %s397_s14 = sshll.u32 %s552_s13, 4  ;;  %s398_s14 = int_to_ptr.vmem [resolvable:$true] %s397_s14 }
  0x15   :  { %212 = vmatpush.msra.mxu3 %v145_v2  ;;  %152 = vmatpush.msra.mxu0 %v112_v3  ;;  %v109_v5 = vld [vmem:[#allocation5 + $0xd8] sm:$0xff]  ;;  %v110_v6 = vld [vmem:[#allocation5 + $0xe0] sm:$0xff]  ;;  %v144_v7 = vld [vmem:[#allocation5 + $0x1f0] sm:$0xff] }
  0x16   :  { %193 = vmatpush.msra.mxu2 %v111_v1  ;;  %v141_v8 = vld [vmem:[#allocation5 + $0x1d8] sm:$0xff]  ;;  %v108_v9 = vld [vmem:[#allocation5 + $0xd0] sm:$0xff]  ;;  %v142_v10 = vld [vmem:[#allocation5 + $0x1e0] sm:$0xff]  ;;  %172 = vmatpush.msra.mxu1 %v144_v7 }
  0x17   :  { %213 = vmatpush.msra.mxu3 %v143_v4  ;;  %153 = vmatpush.msra.mxu0 %v110_v6  ;;  %v107_v11 = vld [vmem:[#allocation5 + $0xc8] sm:$0xff]  ;;  %v106_v13 = vld [vmem:[#allocation5 + $0xc0] sm:$0xff]  ;;  %v140_v14 = vld [vmem:[#allocation5 + $0x1d0] sm:$0xff] }
  0x18   :  { %v139_v12 = vld [vmem:[#allocation5 + $0x1c8] sm:$0xff]  ;;  %194 = vmatpush.msra.mxu2 %v109_v5  ;;  %173 = vmatpush.msra.mxu1 %v142_v10  ;;  %v105_v15 = vld [vmem:[#allocation5 + $0xb8] sm:$0xff]  ;;  %v104_v17 = vld [vmem:[#allocation5 + $0xb0] sm:$0xff] }
  0x19   :  { %214 = vmatpush.msra.mxu3 %v141_v8  ;;  %154 = vmatpush.msra.mxu0 %v108_v9  ;;  %v137_v16 = vld [vmem:[#allocation5 + $0x1b8] sm:$0xff]  ;;  %v138_v18 = vld [vmem:[#allocation5 + $0x1c0] sm:$0xff]  ;;  %v103_v19 = vld [vmem:[#allocation5 + $0xa8] sm:$0xff] }
  0x1a   :  { %195 = vmatpush.msra.mxu2 %v107_v11  ;;  %174 = vmatpush.msra.mxu1 %v140_v14  ;;  %v135_v20 = vld [vmem:[#allocation5 + $0x1a8] sm:$0xff]  ;;  %v102_v21 = vld [vmem:[#allocation5 + $0xa0] sm:$0xff]  ;;  %v136_v22 = vld [vmem:[#allocation5 + $0x1b0] sm:$0xff] }
  0x1b   :  { %215 = vmatpush.msra.mxu3 %v139_v12  ;;  %155 = vmatpush.msra.mxu0 %v106_v13  ;;  %v101_v23 = vld [vmem:[#allocation5 + $0x98] sm:$0xff]  ;;  %v100_v25 = vld [vmem:[#allocation5 + $0x90] sm:$0xff]  ;;  %v134_v26 = vld [vmem:[#allocation5 + $0x1a0] sm:$0xff] }
  0x1c   :  { %196 = vmatpush.msra.mxu2 %v105_v15  ;;  %175 = vmatpush.msra.mxu1 %v138_v18  ;;  %v133_v24 = vld [vmem:[#allocation5 + $0x198] sm:$0xff]  ;;  %v99_v27 = vld [vmem:[#allocation5 + $0x88] sm:$0xff]  ;;  %v98_v29 = vld [vmem:[#allocation5 + $0x80] sm:$0xff] }
  0x1d   :  { %216 = vmatpush.msra.mxu3 %v137_v16  ;;  %156 = vmatpush.msra.mxu0 %v104_v17  ;;  %v131_v28 = vld [vmem:[#allocation5 + $0x188] sm:$0xff]  ;;  %v132_v30 = vld [vmem:[#allocation5 + $0x190] sm:$0xff]  ;;  %v97_v31 = vld [vmem:[#allocation5 + $0x78] sm:$0xff] }
  0x1e   :  { %197 = vmatpush.msra.mxu2 %v103_v19  ;;  %176 = vmatpush.msra.mxu1 %v136_v22  ;;  %v129_v32 = vld [vmem:[#allocation5 + $0x178] sm:$0xff]  ;;  %v96_v33 = vld [vmem:[#allocation5 + $0x70] sm:$0xff]  ;;  %v130_v34 = vld [vmem:[#allocation5 + $0x180] sm:$0xff] }
  0x1f   :  { %217 = vmatpush.msra.mxu3 %v135_v20  ;;  %157 = vmatpush.msra.mxu0 %v102_v21  ;;  %v95_v35 = vld [vmem:[#allocation5 + $0x68] sm:$0xff]  ;;  %v94_v37 = vld [vmem:[#allocation5 + $0x60] sm:$0xff]  ;;  %v128_v38 = vld [vmem:[#allocation5 + $0x170] sm:$0xff] }
  0x20   :  { %198 = vmatpush.msra.mxu2 %v101_v23  ;;  %177 = vmatpush.msra.mxu1 %v134_v26  ;;  %v127_v36 = vld [vmem:[#allocation5 + $0x168] sm:$0xff]  ;;  %v93_v39 = vld [vmem:[#allocation5 + $0x58] sm:$0xff]  ;;  %v92_v41 = vld [vmem:[#allocation5 + $0x50] sm:$0xff] }
  0x21   :  { %218 = vmatpush.msra.mxu3 %v133_v24  ;;  %158 = vmatpush.msra.mxu0 %v100_v25  ;;  %v125_v40 = vld [vmem:[#allocation5 + $0x158] sm:$0xff]  ;;  %v126_v42 = vld [vmem:[#allocation5 + $0x160] sm:$0xff]  ;;  %v91_v43 = vld [vmem:[#allocation5 + $0x48] sm:$0xff] }
  0x22   :  { %199 = vmatpush.msra.mxu2 %v99_v27  ;;  %178 = vmatpush.msra.mxu1 %v132_v30  ;;  %v123_v44 = vld [vmem:[#allocation5 + $0x148] sm:$0xff]  ;;  %v90_v45 = vld [vmem:[#allocation5 + $0x40] sm:$0xff]  ;;  %v124_v46 = vld [vmem:[#allocation5 + $0x150] sm:$0xff] }
  0x23   :  { %219 = vmatpush.msra.mxu3 %v131_v28  ;;  %159 = vmatpush.msra.mxu0 %v98_v29  ;;  %v89_v47 = vld [vmem:[#allocation5 + $0x38] sm:$0xff]  ;;  %v88_v49 = vld [vmem:[#allocation5 + $0x30] sm:$0xff]  ;;  %v122_v50 = vld [vmem:[#allocation5 + $0x140] sm:$0xff] }
  0x24   :  { %200 = vmatpush.msra.mxu2 %v97_v31  ;;  %179 = vmatpush.msra.mxu1 %v130_v34  ;;  %v121_v48 = vld [vmem:[#allocation5 + $0x138] sm:$0xff]  ;;  %v87_v51 = vld [vmem:[#allocation5 + $0x28] sm:$0xff]  ;;  %v86_v53 = vld [vmem:[#allocation5 + $0x20] sm:$0xff] }
  0x25   :  { %220 = vmatpush.msra.mxu3 %v129_v32  ;;  %160 = vmatpush.msra.mxu0 %v96_v33  ;;  %v119_v52 = vld [vmem:[#allocation5 + $0x128] sm:$0xff]  ;;  %v120_v54 = vld [vmem:[#allocation5 + $0x130] sm:$0xff]  ;;  %v85_v55 = vld [vmem:[#allocation5 + $0x18] sm:$0xff] }
  0x26   :  { %201 = vmatpush.msra.mxu2 %v95_v35  ;;  %180 = vmatpush.msra.mxu1 %v128_v38  ;;  %v117_v56 = vld [vmem:[#allocation5 + $0x118] sm:$0xff]  ;;  %v84_v57 = vld [vmem:[#allocation5 + $0x10] sm:$0xff]  ;;  %v118_v58 = vld [vmem:[#allocation5 + $0x120] sm:$0xff] }
  0x27   :  { %221 = vmatpush.msra.mxu3 %v127_v36  ;;  %161 = vmatpush.msra.mxu0 %v94_v37  ;;  %v83_v59 = vld [vmem:[#allocation5 + $0x8] sm:$0xff]  ;;  %v595_v61 = vld [vmem:[#allocation2] sm:$0xff]  ;;  %v597_v62 = vld [vmem:[#allocation2 + $0x8] sm:$0xff] }
  0x28   :  { %202 = vmatpush.msra.mxu2 %v93_v39  ;;  %181 = vmatpush.msra.mxu1 %v126_v42  ;;  %v115_v60 = vld [vmem:[#allocation5 + $0x108] sm:$0xff]  ;;  %v82_v63 = vld [vmem:[#allocation5] sm:$0xff]  ;;  %v116_v0 = vld [vmem:[#allocation5 + $0x110] sm:$0xff] }
  0x29   :  { %222 = vmatpush.msra.mxu3 %v125_v40  ;;  %162 = vmatpush.msra.mxu0 %v92_v41  ;;  %v267_v1 = vld [vmem:[#allocation8 + $0xf8] sm:$0xff]  ;;  %v266_v3 = vld [vmem:[#allocation8 + $0xf0] sm:$0xff]  ;;  %v265_v4 = vld [vmem:[#allocation8 + $0xe8] sm:$0xff] }
  0x2a   :  { %203 = vmatpush.msra.mxu2 %v91_v43  ;;  %182 = vmatpush.msra.mxu1 %v124_v46  ;;  %v114_v2 = vld [vmem:[#allocation5 + $0x100] sm:$0xff]  ;;  %v298_v6 = vld [vmem:[#allocation8 + $0x1f0] sm:$0xff]  ;;  %v297_v11 = vld [vmem:[#allocation8 + $0x1e8] sm:$0xff] }
  0x2b   :  { %223 = vmatpush.msra.mxu3 %v123_v44  ;;  %163 = vmatpush.msra.mxu0 %v90_v45  ;;  %v264_v5 = vld [vmem:[#allocation8 + $0xe0] sm:$0xff]  ;;  %v299_v7 = vld [vmem:[#allocation8 + $0x1f8] sm:$0xff]  ;;  %v262_v9 = vld [vmem:[#allocation8 + $0xd0] sm:$0xff] }
  0x2c   :  { %204 = vmatpush.msra.mxu2 %v89_v47  ;;  %183 = vmatpush.msra.mxu1 %v122_v50  ;;  %v263_v8 = vld [vmem:[#allocation8 + $0xd8] sm:$0xff]  ;;  %v296_v10 = vld [vmem:[#allocation8 + $0x1e0] sm:$0xff]  ;;  %v261_v12 = vld [vmem:[#allocation8 + $0xc8] sm:$0xff] }
  0x2d   :  { %224 = vmatpush.msra.mxu3 %v121_v48  ;;  %164 = vmatpush.msra.mxu0 %v88_v49  ;;  %v260_v13 = vld [vmem:[#allocation8 + $0xc0] sm:$0xff]  ;;  %v294_v14 = vld [vmem:[#allocation8 + $0x1d0] sm:$0xff]  ;;  %v295_v15 = vld [vmem:[#allocation8 + $0x1d8] sm:$0xff] }
  0x2e   :  { %205 = vmatpush.msra.mxu2 %v87_v51  ;;  %184 = vmatpush.msra.mxu1 %v120_v54  ;;  %v259_v16 = vld [vmem:[#allocation8 + $0xb8] sm:$0xff]  ;;  %v258_v17 = vld [vmem:[#allocation8 + $0xb0] sm:$0xff]  ;;  %v292_v18 = vld [vmem:[#allocation8 + $0x1c0] sm:$0xff] }
  0x2f   :  { %225 = vmatpush.msra.mxu3 %v119_v52  ;;  %165 = vmatpush.msra.mxu0 %v86_v53  ;;  %v293_v19 = vld [vmem:[#allocation8 + $0x1c8] sm:$0xff]  ;;  %v256_v21 = vld [vmem:[#allocation8 + $0xa0] sm:$0xff]  ;;  %v290_v22 = vld [vmem:[#allocation8 + $0x1b0] sm:$0xff] }
  0x30   :  { %206 = vmatpush.msra.mxu2 %v85_v55  ;;  %185 = vmatpush.msra.mxu1 %v118_v58  ;;  %v257_v20 = vld [vmem:[#allocation8 + $0xa8] sm:$0xff]  ;;  %v291_v23 = vld [vmem:[#allocation8 + $0x1b8] sm:$0xff]  ;;  %v254_v25 = vld [vmem:[#allocation8 + $0x90] sm:$0xff] }
  0x31   :  { %226 = vmatpush.msra.mxu3 %v117_v56  ;;  %166 = vmatpush.msra.mxu0 %v84_v57  ;;  %v255_v24 = vld [vmem:[#allocation8 + $0x98] sm:$0xff]  ;;  %v288_v26 = vld [vmem:[#allocation8 + $0x1a0] sm:$0xff]  ;;  %v289_v27 = vld [vmem:[#allocation8 + $0x1a8] sm:$0xff] }
  0x32   :  { %207 = vmatpush.msra.mxu2 %v83_v59  ;;  %186 = vmatpush.msra.mxu1 %v116_v0  ;;  %v253_v28 = vld [vmem:[#allocation8 + $0x88] sm:$0xff]  ;;  %v252_v29 = vld [vmem:[#allocation8 + $0x80] sm:$0xff]  ;;  %v286_v30 = vld [vmem:[#allocation8 + $0x190] sm:$0xff] }
  0x33   :  { %227 = vmatpush.msra.mxu3 %v115_v60  ;;  %208 = vmatmul.f32.vlgmr.msra.gmra.mxu2 %v595_v61  ;;  %v287_v31 = vld [vmem:[#allocation8 + $0x198] sm:$0xff]  ;;  %v250_v33 = vld [vmem:[#allocation8 + $0x70] sm:$0xff]  ;;  %v284_v34 = vld [vmem:[#allocation8 + $0x180] sm:$0xff] }
  0x34   :  { %228 = vmatmul.f32.vlgmr.msra.gmra.mxu3 %v597_v62  ;;  %167 = vmatpush.msra.mxu0 %v82_v63  ;;  %v251_v32 = vld [vmem:[#allocation8 + $0x78] sm:$0xff]  ;;  %v285_v35 = vld [vmem:[#allocation8 + $0x188] sm:$0xff]  ;;  %v248_v37 = vld [vmem:[#allocation8 + $0x60] sm:$0xff] }
  0x35   :  { %168 = vmatmul.f32.vlgmr.msra.gmra.mxu0 %v595_v61  ;;  %346 = vmatpush.msrb.mxu2 %v267_v1  ;;  %v249_v36 = vld [vmem:[#allocation8 + $0x68] sm:$0xff]  ;;  %v282_v38 = vld [vmem:[#allocation8 + $0x170] sm:$0xff]  ;;  %v283_v39 = vld [vmem:[#allocation8 + $0x178] sm:$0xff] }
  0x36   :  { %187 = vmatpush.msra.mxu1 %v114_v2  ;;  %306 = vmatpush.msrb.mxu0 %v266_v3  ;;  %v247_v40 = vld [vmem:[#allocation8 + $0x58] sm:$0xff]  ;;  %v246_v41 = vld [vmem:[#allocation8 + $0x50] sm:$0xff]  ;;  %v280_v42 = vld [vmem:[#allocation8 + $0x160] sm:$0xff] }
  0x37   :  { %188 = vmatmul.f32.vlgmr.msra.gmra.mxu1 %v597_v62  ;;  %347 = vmatpush.msrb.mxu2 %v265_v4  ;;  %v281_v43 = vld [vmem:[#allocation8 + $0x168] sm:$0xff]  ;;  %v244_v44 = vld [vmem:[#allocation8 + $0x40] sm:$0xff]  ;;  %v278_v45 = vld [vmem:[#allocation8 + $0x150] sm:$0xff] }
  0x38   :  { %307 = vmatpush.msrb.mxu0 %v264_v5  ;;  %326 = vmatpush.msrb.mxu1 %v298_v6  ;;  %v245_v46 = vld [vmem:[#allocation8 + $0x48] sm:$0xff]  ;;  %v279_v47 = vld [vmem:[#allocation8 + $0x158] sm:$0xff]  ;;  %v242_v48 = vld [vmem:[#allocation8 + $0x30] sm:$0xff] }
  0x39   :  { %366 = vmatpush.msrb.mxu3 %v299_v7  ;;  %348 = vmatpush.msrb.mxu2 %v263_v8  ;;  %v276_v49 = vld [vmem:[#allocation8 + $0x140] sm:$0xff]  ;;  %v243_v50 = vld [vmem:[#allocation8 + $0x38] sm:$0xff]  ;;  %v277_v51 = vld [vmem:[#allocation8 + $0x148] sm:$0xff] }
  0x3a   :  { %308 = vmatpush.msrb.mxu0 %v262_v9  ;;  %327 = vmatpush.msrb.mxu1 %v296_v10  ;;  %v240_v52 = vld [vmem:[#allocation8 + $0x20] sm:$0xff]  ;;  %v274_v53 = vld [vmem:[#allocation8 + $0x130] sm:$0xff]  ;;  %v241_v54 = vld [vmem:[#allocation8 + $0x28] sm:$0xff] }
  0x3b   :  { %367 = vmatpush.msrb.mxu3 %v297_v11  ;;  %349 = vmatpush.msrb.mxu2 %v261_v12  ;;  %v275_v55 = vld [vmem:[#allocation8 + $0x138] sm:$0xff]  ;;  %v238_v56 = vld [vmem:[#allocation8 + $0x10] sm:$0xff]  ;;  %v272_v57 = vld [vmem:[#allocation8 + $0x120] sm:$0xff] }
  0x3c   :  { %309 = vmatpush.msrb.mxu0 %v260_v13  ;;  %328 = vmatpush.msrb.mxu1 %v294_v14  ;;  %v239_v58 = vld [vmem:[#allocation8 + $0x18] sm:$0xff]  ;;  %v273_v59 = vld [vmem:[#allocation8 + $0x128] sm:$0xff]  ;;  %v236_v60 = vld [vmem:[#allocation8] sm:$0xff] }
  0x3d   :  { %368 = vmatpush.msrb.mxu3 %v295_v15  ;;  %350 = vmatpush.msrb.mxu2 %v259_v16  ;;  %v270_v63 = vld [vmem:[#allocation8 + $0x110] sm:$0xff]  ;;  %v237_v0 = vld [vmem:[#allocation8 + $0x8] sm:$0xff]  ;;  %v271_v1 = vld [vmem:[#allocation8 + $0x118] sm:$0xff] }
  0x3e   :  { %310 = vmatpush.msrb.mxu0 %v258_v17  ;;  %329 = vmatpush.msrb.mxu1 %v292_v18  ;;  %v268_v2 = vld [vmem:[#allocation8 + $0x100] sm:$0xff]  ;;  %v269_v3 = vld [vmem:[#allocation8 + $0x108] sm:$0xff]  ;;  %v146_v4 = vld [vmem:[#allocation7] sm:$0x3] }
  0x3f   :  { %369 = vmatpush.msrb.mxu3 %v293_v19  ;;  %351 = vmatpush.msrb.mxu2 %v257_v20  ;;  %v148_v5 = vperm.slane %v146_v4, 0  ;;  %v149_v8 = vperm.slane %v146_v4, 1  ;;  %v300_v19 = vld [vmem:[%s617_s4] sm:$0x3]  ;;  %s399_s4 = sshll.u32 %s618_s5, 4  ;;  %s400_s4 = int_to_ptr.hbm [resolvable:$true] %s399_s4 }
  0x40   :  { %311 = vmatpush.msrb.mxu0 %v256_v21  ;;  %330 = vmatpush.msrb.mxu1 %v290_v22  ;;  %v302_v20 = vperm.slane %v300_v19, 0 }
  0x41   :  { %370 = vmatpush.msrb.mxu3 %v291_v23  ;;  %352 = vmatpush.msrb.mxu2 %v255_v24  ;;  %v303_v23 = vperm.slane %v300_v19, 1 }
  0x42   :  { %312 = vmatpush.msrb.mxu0 %v254_v25  ;;  %331 = vmatpush.msrb.mxu1 %v288_v26 }
  0x43   :  { %371 = vmatpush.msrb.mxu3 %v289_v27  ;;  %353 = vmatpush.msrb.mxu2 %v253_v28 }
  0x44   :  { %313 = vmatpush.msrb.mxu0 %v252_v29  ;;  %332 = vmatpush.msrb.mxu1 %v286_v30 }
  0x45   :  { %372 = vmatpush.msrb.mxu3 %v287_v31  ;;  %354 = vmatpush.msrb.mxu2 %v251_v32 }
  0x46   :  { %314 = vmatpush.msrb.mxu0 %v250_v33  ;;  %333 = vmatpush.msrb.mxu1 %v284_v34 }
  0x47   :  { %373 = vmatpush.msrb.mxu3 %v285_v35  ;;  %355 = vmatpush.msrb.mxu2 %v249_v36 }
  0x48   :  { %315 = vmatpush.msrb.mxu0 %v248_v37  ;;  %334 = vmatpush.msrb.mxu1 %v282_v38 }
  0x49   :  { %374 = vmatpush.msrb.mxu3 %v283_v39  ;;  %356 = vmatpush.msrb.mxu2 %v247_v40 }
  0x4a   :  { %316 = vmatpush.msrb.mxu0 %v246_v41  ;;  %335 = vmatpush.msrb.mxu1 %v280_v42 }
  0x4b   :  { %375 = vmatpush.msrb.mxu3 %v281_v43  ;;  %357 = vmatpush.msrb.mxu2 %v245_v46 }
  0x4c   :  { %317 = vmatpush.msrb.mxu0 %v244_v44  ;;  %336 = vmatpush.msrb.mxu1 %v278_v45 }
  0x4d   :  { %376 = vmatpush.msrb.mxu3 %v279_v47  ;;  %358 = vmatpush.msrb.mxu2 %v243_v50 }
  0x4e   :  { %318 = vmatpush.msrb.mxu0 %v242_v48  ;;  %337 = vmatpush.msrb.mxu1 %v276_v49 }
  0x4f   :  { %377 = vmatpush.msrb.mxu3 %v277_v51  ;;  %359 = vmatpush.msrb.mxu2 %v241_v54 }
  0x50   :  { %319 = vmatpush.msrb.mxu0 %v240_v52  ;;  %338 = vmatpush.msrb.mxu1 %v274_v53 }
  0x51   :  { %378 = vmatpush.msrb.mxu3 %v275_v55  ;;  %360 = vmatpush.msrb.mxu2 %v239_v58 }
  0x52   :  { %320 = vmatpush.msrb.mxu0 %v238_v56  ;;  %339 = vmatpush.msrb.mxu1 %v272_v57 }
  0x53   :  { %379 = vmatpush.msrb.mxu3 %v273_v59  ;;  %361 = vmatpush.msrb.mxu2 %v237_v0 }
  0x54   :  { %321 = vmatpush.msrb.mxu0 %v236_v60  ;;  %340 = vmatpush.msrb.mxu1 %v270_v63 }
  0x55   :  { %380 = vmatpush.msrb.mxu3 %v271_v1 }
  0x56   :  { %341 = vmatpush.msrb.mxu1 %v268_v2 }
  0x57   :  { %381 = vmatpush.msrb.mxu3 %v269_v3 }
  0xb2   :  { %v169_v6 = vpop.f32.mrf.mxu0 }
  0xb3   :  { %v170_v7 = vadd.f32 %v169_v6, %v148_v5 }
  0xb4   :  { %v189_v9 = vpop.f32.mrf.mxu1 }
  0xb5   :  { %v190_v10 = vadd.f32 %v189_v9, %v170_v7 }
  0xb6   :  { %v209_v11 = vpop.f32.mrf.mxu2 }
  0xb7   :  { %v229_v12 = vpop.f32.mrf.mxu3  ;;  %v232_v13 = vmax.f32 %v190_v10, 0.0  ;;  %v210_v14 = vadd.f32 %v209_v11, %v149_v8 }
  0xb9   :  { %v234_v15 = vadd.f32 %v232_v13, %v595_v61  ;;  %v230_v16 = vadd.f32 %v229_v12, %v210_v14 }
  0xbb   :  { %v233_v17 = vmax.f32 %v230_v16, 0.0  ;;  %322 = vmatmul.f32.vlgmr.msrb.gmra.mxu0 %v234_v15  ;;  %362 = vmatmul.f32.vlgmr.msrb.gmra.mxu2 %v234_v15 }
  0xbd   :  { %v235_v18 = vadd.f32 %v233_v17, %v597_v62 }
  0xbf   :  { %342 = vmatmul.f32.vlgmr.msrb.gmra.mxu1 %v235_v18  ;;  %382 = vmatmul.f32.vlgmr.msrb.gmra.mxu3 %v235_v18 }
 0x138   :  { %v323_v21 = vpop.f32.mrf.mxu0 }
 0x139   :  { %v324_v22 = vadd.f32 %v323_v21, %v302_v20 }
 0x13c   :  { %v343_v24 = vpop.f32.mrf.mxu1 }
 0x13d   :  { %v344_v25 = vadd.f32 %v343_v24, %v324_v22 }
 0x13e   :  { %v363_v26 = vpop.f32.mrf.mxu2 }
 0x13f   :  { %v386_v27 = vmax.f32 %v344_v25, 0.0  ;;  %v364_v28 = vadd.f32 %v363_v26, %v303_v23 }
 0x141   :  { %v388_v29 = vadd.f32 %v386_v27, %v595_v61 }
 0x142   :  { %v383_v30 = vpop.f32.mrf.mxu3 }
 0x143   :  { %390 = vst [vmem:[#allocation10] sm:$0xff] %v388_v29  ;;  %v384_v31 = vadd.f32 %v383_v30, %v364_v28 }
 0x145   :  { %v387_v32 = vmax.f32 %v384_v31, 0.0 }
 0x147   :  { %v389_v33 = vadd.f32 %v387_v32, %v597_v62 }
 0x149   :  { %391 = vst [vmem:[#allocation10 + $0x8] sm:$0xff] %v389_v33 }
 0x14a   :  { %402 = dma.vmem_to_hbm [thread:$0]  %s398_s14, 256, %s400_s4, [#allocation4]  }
 0x14b   :  { %544 = dma.done.wait [#allocation4], 256  }
 0x14c   :  { %545 = vsyncadd [#allocation4], 4294967040 }
 0x14d   :  { %407 = vsyncpa [#allocation3], 1 }
 0x14e   :  { %408 = vsyncpa [#allocation6], 1 }
 0x14f   :  { %409 = vsyncpa [#allocation9], 1 }
 0x150   :  { %410 = vsyncpa [#allocation4], 1 }

</bundles_post_ra>
